<compile_context>
chip_gen: v5e
topology: v5e:2x2
jax: 0.10.0
libtpu: 0.0.40
codegen_flags: <defaults>
</compile_context>

<pallas_src>
import functools

import jax
import jax.numpy as jnp
from jax.experimental import pallas as pl
from jax.experimental.pallas import tpu as pltpu


def _loss_kernel(pred_ref, tgt_ref, trans_ref, out_ref, *, scale):
    # ---- feature-transform regularizer, vectorized over the batch tile ----
    t = trans_ref[...]                                              # (TB, D, D) f32
    d = t.shape[-1]
    gram = jnp.einsum("bij,bkj->bik", t, t,
                      preferred_element_type=jnp.float32)           # (TB, D, D) on MXU
    # ||G - I||_F^2 = ||G||_F^2 - 2*tr(G) + D, with tr(G) = tr(t t^T) = ||t||_F^2
    sum_g2 = jnp.sum(jnp.sum(gram * gram, axis=2), axis=1, keepdims=True)  # (TB, 1)
    trace = jnp.sum(jnp.sum(t * t, axis=2), axis=1, keepdims=True)         # (TB, 1)
    frob = jnp.sqrt(jnp.maximum(sum_g2 - 2.0 * trace + jnp.float32(d),
                                jnp.float32(0.0)))                         # (TB, 1)

    # ---- NLL, vectorized: one-hot lane mask over classes ----
    pred = pred_ref[...]                                            # (TB, K)
    tgt = tgt_ref[...]                                              # (TB, 1) int32
    tb, k = pred.shape
    kmask = jax.lax.broadcasted_iota(jnp.int32, (tb, k), 1) == tgt  # (TB, K)
    nll = -jnp.sum(jnp.where(kmask, pred, jnp.float32(0.0)),
                   axis=1, keepdims=True)                           # (TB, 1)

    # Per-sample combined contribution for this tile; padded samples are
    # sliced off in the wrapper before the final mean.
    out_ref[0] = nll + jnp.float32(scale) * frob


def get_loss(pred, target, trans_feat, mat_diff_loss_scale=0.001):
    pred = pred.astype(jnp.float32)
    trans_feat = trans_feat.astype(jnp.float32)
    target = target.astype(jnp.int32)

    B, K = pred.shape
    _, D, _ = trans_feat.shape

    # Batch-tile size: ~4 MiB of trans_feat per tile (the dominant HBM stream),
    # a multiple of 8 sublanes, capped at 512 so per-tile intermediates stay
    # well under the v7x scoped-VMEM budget. Small batches use a single tile.
    bytes_per_sample = D * D * 4
    tb = (4 * 1024 * 1024) // max(bytes_per_sample, 1)
    tb = max(8, min(512, (tb // 8) * 8))
    if B <= tb:
        tb = max(8, -(-B // 8) * 8)          # single tile, rounded to sublanes
    n_tiles = -(-B // tb)
    b_pad = n_tiles * tb

    if b_pad != B:
        pad = b_pad - B
        pred = jnp.pad(pred, ((0, pad), (0, 0)))
        target = jnp.pad(target, ((0, pad),))
        trans_feat = jnp.pad(trans_feat, ((0, pad), (0, 0), (0, 0)))

    target2d = target.reshape(b_pad, 1)

    kernel = functools.partial(_loss_kernel, scale=float(mat_diff_loss_scale))

    partials = pl.pallas_call(
        kernel,
        out_shape=jax.ShapeDtypeStruct((n_tiles, tb, 1), jnp.float32),
        grid_spec=pltpu.PrefetchScalarGridSpec(
            num_scalar_prefetch=0,
            grid=(n_tiles,),
            in_specs=[
                pl.BlockSpec((tb, K), lambda i: (i, 0)),        # pred tile
                pl.BlockSpec((tb, 1), lambda i: (i, 0)),        # target tile
                pl.BlockSpec((tb, D, D), lambda i: (i, 0, 0)),  # trans tile
            ],
            out_specs=pl.BlockSpec((1, tb, 1), lambda i: (i, 0, 0)),
        ),
        compiler_params=pltpu.CompilerParams(
            dimension_semantics=("parallel",),   # independent tiles -> megacore OK
        ),
    )(pred, target2d, trans_feat)

    # Drop padded samples, then take the mean (== mean(nll) + scale*mean(frob)).
    per_sample = partials.reshape(-1)[:B]
    return jnp.sum(per_sample) / jnp.float32(B)


def _reference_loss(pred, target, trans_feat, scale=0.001):
    # pure-JAX reference mirroring the PyTorch module
    nll = -jnp.mean(jnp.take_along_axis(pred, target[:, None], axis=1)[:, 0])
    d = trans_feat.shape[1]
    eye = jnp.eye(d, dtype=jnp.float32)[None]
    gram = jnp.einsum("bij,bkj->bik", trans_feat, trans_feat)
    frob = jnp.sqrt(jnp.sum((gram - eye) ** 2, axis=(1, 2)))
    return nll + scale * jnp.mean(frob)


if __name__ == "__main__":
    key = jax.random.PRNGKey(0)
    k1, k2, k3 = jax.random.split(key, 3)

    B, K, D = 4, 16, 32
    logits = jax.random.normal(k1, (B, K), dtype=jnp.float32)
    pred = jax.nn.log_softmax(logits, axis=-1)                 # log-probs, like PointNet head
    target = jax.random.randint(k2, (B,), 0, K, dtype=jnp.int32)
    trans_feat = (jnp.eye(D, dtype=jnp.float32)[None]
                  + 0.1 * jax.random.normal(k3, (B, D, D), dtype=jnp.float32))

    loss = get_loss(pred, target, trans_feat)
    loss = jax.block_until_ready(loss)

    ref = _reference_loss(pred, target, trans_feat)
    assert jnp.allclose(loss, ref, rtol=1e-3, atol=1e-3), (loss, ref)

    print("KERNEL_OK")
</pallas_src>

<mosaic_0001>
module attributes {stable_mosaic.version = 11 : i64} {
  func.func @_loss_kernel(%arg0: i32, %arg1: memref<8x16xf32, #tpu.memory_space<vmem>>, %arg2: memref<8x1xi32, #tpu.memory_space<vmem>>, %arg3: memref<8x32x32xf32, #tpu.memory_space<vmem>>, %arg4: memref<1x8x1xf32, #tpu.memory_space<vmem>>) attributes {dimension_semantics = [#tpu.dimension_semantics<parallel>], iteration_bounds = array<i64: 1>, scalar_prefetch = 0 : i64, scratch_operands = 0 : i64, tpu.core_type = #tpu.core_type<tc>, window_params = [{transform_indices = @transform_0, window_bounds = array<i64: 8, 16>}, {transform_indices = @transform_1, window_bounds = array<i64: 8, 1>}, {transform_indices = @transform_2, window_bounds = array<i64: 8, 32, 32>}, {transform_indices = @transform_3, window_bounds = array<i64: 1, 8, 1>}]} {
    %c0 = arith.constant 0 : index
    %c0_0 = arith.constant 0 : index
    %c0_1 = arith.constant 0 : index
    %0 = vector.load %arg3[%c0, %c0_0, %c0_1] : memref<8x32x32xf32, #tpu.memory_space<vmem>>, vector<8x32x32xf32>
    "tpu.trace_start"() <{level = 10 : i32, message = "bij,bkj->bik"}> : () -> ()
    %cst = arith.constant dense<0.000000e+00> : vector<8x32x32xf32>
    %1 = tpu.matmul %0, %0, %cst {dimension_numbers = #tpu.dot_dimension_numbers<[2], [2], [1], [1], [0, 0, 0, 1, 1, 1], [0], [0]>} : vector<8x32x32xf32>, vector<8x32x32xf32>, vector<8x32x32xf32> -> vector<8x32x32xf32>
    "tpu.trace_stop"() : () -> ()
    %2 = arith.mulf %1, %1 : vector<8x32x32xf32>
    %cst_2 = arith.constant dense<0.000000e+00> : vector<8x32xf32>
    %3 = vector.multi_reduction <add>, %2, %cst_2 [2] : vector<8x32x32xf32> to vector<8x32xf32>
    %cst_3 = arith.constant dense<0.000000e+00> : vector<8xf32>
    %4 = vector.multi_reduction <add>, %3, %cst_3 [1] : vector<8x32xf32> to vector<8xf32>
    %5 = vector.shape_cast %4 : vector<8xf32> to vector<8x1xf32>
    %6 = arith.mulf %0, %0 : vector<8x32x32xf32>
    %cst_4 = arith.constant dense<0.000000e+00> : vector<8x32xf32>
    %7 = vector.multi_reduction <add>, %6, %cst_4 [2] : vector<8x32x32xf32> to vector<8x32xf32>
    %cst_5 = arith.constant dense<0.000000e+00> : vector<8xf32>
    %8 = vector.multi_reduction <add>, %7, %cst_5 [1] : vector<8x32xf32> to vector<8xf32>
    %9 = vector.shape_cast %8 : vector<8xf32> to vector<8x1xf32>
    %cst_6 = arith.constant 2.000000e+00 : f32
    %10 = vector.broadcast %cst_6 : f32 to vector<8x1xf32>
    %11 = arith.mulf %10, %9 : vector<8x1xf32>
    %12 = arith.subf %5, %11 : vector<8x1xf32>
    %cst_7 = arith.constant 3.200000e+01 : f32
    %13 = vector.broadcast %cst_7 : f32 to vector<8x1xf32>
    %14 = arith.addf %12, %13 : vector<8x1xf32>
    %cst_8 = arith.constant 0.000000e+00 : f32
    %15 = vector.broadcast %cst_8 : f32 to vector<8x1xf32>
    %16 = arith.maximumf %14, %15 : vector<8x1xf32>
    %17 = math.sqrt %16 : vector<8x1xf32>
    %c0_9 = arith.constant 0 : index
    %c0_10 = arith.constant 0 : index
    %18 = vector.load %arg1[%c0_9, %c0_10] : memref<8x16xf32, #tpu.memory_space<vmem>>, vector<8x16xf32>
    %c0_11 = arith.constant 0 : index
    %c0_12 = arith.constant 0 : index
    %19 = vector.load %arg2[%c0_11, %c0_12] : memref<8x1xi32, #tpu.memory_space<vmem>>, vector<8x1xi32>
    %20 = tpu.iota {dimensions = array<i32: 1>} : vector<8x16xi32>
    %21 = vector.broadcast %19 : vector<8x1xi32> to vector<8x16xi32>
    %22 = arith.cmpi eq, %20, %21 : vector<8x16xi32>
    %cst_13 = arith.constant 0.000000e+00 : f32
    %23 = vector.broadcast %cst_13 : f32 to vector<8x16xf32>
    %24 = arith.select %22, %18, %23 : vector<8x16xi1>, vector<8x16xf32>
    %cst_14 = arith.constant dense<0.000000e+00> : vector<8xf32>
    %25 = vector.multi_reduction <add>, %24, %cst_14 [1] : vector<8x16xf32> to vector<8xf32>
    %26 = vector.shape_cast %25 : vector<8xf32> to vector<8x1xf32>
    %cst_15 = arith.constant 0.000000e+00 : f32
    %27 = vector.broadcast %cst_15 : f32 to vector<8x1xf32>
    %28 = arith.subf %27, %26 : vector<8x1xf32>
    %cst_16 = arith.constant 1.000000e-03 : f32
    %29 = vector.broadcast %cst_16 : f32 to vector<8x1xf32>
    %30 = arith.mulf %29, %17 : vector<8x1xf32>
    %31 = arith.addf %28, %30 : vector<8x1xf32>
    %c0_17 = arith.constant 0 : index
    %c0_18 = arith.constant 0 : index
    %c0_19 = arith.constant 0 : index
    %32 = vector.load %arg4[%c0_17, %c0_18, %c0_19] : memref<1x8x1xf32, #tpu.memory_space<vmem>>, vector<1x8x1xf32>
    %33 = vector.shape_cast %32 : vector<1x8x1xf32> to vector<8x1xf32>
    %34 = vector.shape_cast %31 : vector<8x1xf32> to vector<1x8x1xf32>
    tpu.vector_store %arg4[%c0_17, %c0_18, %c0_19], %34 {strides = array<i32>} : memref<1x8x1xf32, #tpu.memory_space<vmem>>, vector<1x8x1xf32>,
    return
  }
  func.func @transform_0(%arg0: i32) -> (i32, i32) {
    %c0_i32 = arith.constant 0 : i32
    %c0_i32_0 = arith.constant 0 : i32
    return %arg0, %c0_i32 : i32, i32
  }
  func.func @transform_1(%arg0: i32) -> (i32, i32) {
    %c0_i32 = arith.constant 0 : i32
    %c0_i32_0 = arith.constant 0 : i32
    return %arg0, %c0_i32 : i32, i32
  }
  func.func @transform_2(%arg0: i32) -> (i32, i32, i32) {
    %c0_i32 = arith.constant 0 : i32
    %c0_i32_0 = arith.constant 0 : i32
    %c0_i32_1 = arith.constant 0 : i32
    return %arg0, %c0_i32, %c0_i32_0 : i32, i32, i32
  }
  func.func @transform_3(%arg0: i32) -> (i32, i32, i32) {
    %c0_i32 = arith.constant 0 : i32
    %c0_i32_0 = arith.constant 0 : i32
    %c0_i32_1 = arith.constant 0 : i32
    return %arg0, %c0_i32, %c0_i32_0 : i32, i32, i32
  }
}

</mosaic_0001>

<bundles_post_ra>
// kernel: tpu_custom_call.1
= control target key start
LH: loop header
LB: loop body
LE: loop exit
PB: predicated region body
PF: predicated region fallthrough
CT: control target
= control target key end

     0   :  { %8 = vsyncpa [#allocation3], 0  ;;  %s995_s15 = smov [#allocation2]   ;;  %s996_s17 = smov 128   ;;  %s1435_s0 = inlined_call_operand.vmem [shape: f32[8,16], index: 0, kind: input, shape index: {}]   ;;  %s1436_s1 = inlined_call_operand.vmem [shape: s32[8,1], index: 1, kind: input, shape index: {}]   ;;  %s1437_s2 = inlined_call_operand.hbm [shape: f32[8,32,32], index: 2, kind: input, shape index: {}]   ;;  %s1438_s3 = inlined_call_operand.vmem [shape: f32[1,8,1], index: 3, kind: output, shape index: {}]  }
   0x1   :  { %s17_s14 = sshll.u32 %s1437_s2, 4  ;;  %s19_s16 = sshll.u32 %s995_s15, 4  ;;  %s18_s14 = int_to_ptr.hbm [resolvable:$true] %s17_s14  ;;  %s20_s16 = int_to_ptr.vmem [resolvable:$true] %s19_s16 }
   0x2   :  { %s997_s18 = smov 8  }
   0x3   :  { %25 = dma.hbm_to_vmem [thread:$0]  %s18_s14, 4096, %s20_s16, [#allocation3], %s996_s17, %s996_s17, %s997_s18  }
   0x4   :  { %993 = dma.done.wait [#allocation3], 4096  }
   0x5   :  { %994 = vsyncadd [#allocation3], 4294963200  ;;  %vm62_vm0 = vcmask 261120   ;;  %v1022_v0 = vld [vmem:[#allocation2 + $0x18] sm:$0xff]  ;;  %v1038_v4 = vld [vmem:[#allocation2 + $0x10] sm:$0xff]  ;;  %vm556_vm1 = vcmask 130112  }
   0x6   :  { %v1024_v1 = vld [vmem:[#allocation2 + $0x38] sm:$0xff]  ;;  %897 = vmatpush.xpose.msk.msra.mxu0 %vm62_vm0, %v1022_v0  ;;  %v1040_v5 = vld [vmem:[#allocation2 + $0x30] sm:$0xff]  ;;  %v1042_v6 = vld [vmem:[#allocation2 + $0x8] sm:$0xff]  ;;  %v635_v20 = vmul.f32 %v1038_v4, %v1038_v4  ;;  %v636_v34 = vmul.f32 %v1022_v0, %v1022_v0  ;;  %vm560_vm2 = vcmask 195712   ;;  %vm564_vm3 = vcmask 261312  }
   0x7   :  { %v1026_v2 = vld [vmem:[#allocation2 + $0x78] sm:$0xff]  ;;  %905 = vmatpush.xpose.msk.msra.mxu1 %vm62_vm0, %v1024_v1  ;;  %v1044_v7 = vld [vmem:[#allocation2 + $0x70] sm:$0xff]  ;;  %v634_v9 = vmul.f32 %v1042_v6, %v1042_v6  ;;  %v34_v10 = vld [vmem:[#allocation2 + $0x20] sm:$0xff]  ;;  %v639_v23 = vmul.f32 %v1040_v5, %v1040_v5  ;;  %v640_v46 = vmul.f32 %v1024_v1, %v1024_v1  ;;  %vm615_vm4 = vcmask 1041409  }
   0x8   :  { %v1032_v3 = vld [vmem:[#allocation2 + $0x58] sm:$0xff]  ;;  %921 = vmatpush.xpose.msk.msra.mxu3 %vm62_vm0, %v1026_v2  ;;  %v1046_v8 = vld [vmem:[#allocation2 + $0x50] sm:$0xff]  ;;  %v30_v11 = vld [vmem:[#allocation2] sm:$0xff]  ;;  %v637_v12 = vmul.f32 %v34_v10, %v34_v10  ;;  %v671_v25 = vsel %vm62_vm0, %v635_v20, 0.0  ;;  %v674_v38 = vsel %vm62_vm0, %v636_v34, 0.0  ;;  %v647_v55 = vmul.f32 %v1044_v7, %v1044_v7 }
   0x9   :  { %913 = vmatpush.xpose.msk.msra.mxu2 %vm62_vm0, %v1032_v3  ;;  %v633_v13 = vmul.f32 %v30_v11, %v30_v11  ;;  %v668_v14 = vsel %vm62_vm0, %v634_v9, 0.0  ;;  %v35_v15 = vld [vmem:[#allocation2 + $0x28] sm:$0xff]  ;;  %v42_v21 = vld [vmem:[#allocation2 + $0x60] sm:$0xff]  ;;  %v1074_v26 = vld [vmem:[#allocation2 + $0x98] sm:$0xff]  ;;  %v683_v27 = vsel %vm62_vm0, %v639_v23, 0.0  ;;  %v643_v40 = vmul.f32 %v1046_v8, %v1046_v8 }
   0xa   :  { %898 = vmatpush.xpose.msk.msra.mxu0 %vm62_vm0, %v1038_v4  ;;  %v1059_v16 = vld [vmem:[#allocation2 + $0x68] sm:$0xff]  ;;  %v677_v18 = vsel %vm62_vm0, %v637_v12, 0.0  ;;  %669 = vadd.xlane.f32.xlu1 %v668_v14  ;;  %v38_v22 = vld [vmem:[#allocation2 + $0x40] sm:$0xff]  ;;  %v638_v24 = vmul.f32 %v35_v15, %v35_v15  ;;  %v1086_v30 = vld [vmem:[#allocation2 + $0xd8] sm:$0xff]  ;;  %v645_v45 = vmul.f32 %v42_v21, %v42_v21  ;;  %v686_v50 = vsel %vm62_vm0, %v640_v46, 0.0 }
   0xb   :  { %906 = vmatpush.xpose.msk.msra.mxu1 %vm62_vm0, %v1040_v5  ;;  %v39_v17 = vld [vmem:[#allocation2 + $0x48] sm:$0xff]  ;;  %v665_v19 = vsel %vm62_vm0, %v633_v13, 0.0  ;;  %678 = vadd.xlane.f32.xlu2 %v677_v18  ;;  %v1088_v31 = vld [vmem:[#allocation2 + $0xf8] sm:$0xff]  ;;  %v1094_v33 = vld [vmem:[#allocation2 + $0x90] sm:$0xff]  ;;  %v641_v35 = vmul.f32 %v38_v22, %v38_v22  ;;  %v695_v47 = vsel %vm62_vm0, %v643_v40, 0.0  ;;  %v644_v51 = vmul.f32 %v1032_v3, %v1032_v3 }
   0xc   :  { %922 = vmatpush.xpose.msk.msra.mxu3 %vm62_vm0, %v1044_v7  ;;  %666 = vadd.xlane.f32.xlu0 %v665_v19  ;;  %v680_v28 = vsel %vm62_vm0, %v638_v24, 0.0  ;;  %v642_v29 = vmul.f32 %v39_v17, %v39_v17  ;;  %v1092_v32 = vld [vmem:[#allocation2 + $0xb8] sm:$0xff]  ;;  %v1107_v37 = vld [vmem:[#allocation2 + $0xd0] sm:$0xff]  ;;  %v1125_v43 = vld [vmem:[#allocation2 + $0xc8] sm:$0xff]  ;;  %v701_v49 = vsel %vm62_vm0, %v645_v45, 0.0  ;;  %v646_v56 = vmul.f32 %v1059_v16, %v1059_v16 }
   0xd   :  { %914 = vmatpush.xpose.msk.msra.mxu2 %vm62_vm0, %v1046_v8  ;;  %v689_v39 = vsel %vm62_vm0, %v641_v35, 0.0  ;;  %v1118_v41 = vld [vmem:[#allocation2 + $0xf0] sm:$0xff]  ;;  %v1127_v44 = vld [vmem:[#allocation2 + $0x88] sm:$0xff]  ;;  %v54_v52 = vld [vmem:[#allocation2 + $0xc0] sm:$0xff]  ;;  %v698_v58 = vsel %vm62_vm0, %v644_v51, 0.0  ;;  %v707_v60 = vsel %vm62_vm0, %v647_v55, 0.0  ;;  %v648_v63 = vmul.f32 %v1026_v2, %v1026_v2 }
   0xe   :  { %899 = vmatpush.xpose.msk.msra.mxu0 %vm62_vm0, %v1042_v6  ;;  %v692_v36 = vsel %vm62_vm0, %v642_v29, 0.0  ;;  %v1120_v42 = vld [vmem:[#allocation2 + $0xb0] sm:$0xff]  ;;  %v51_v48 = vld [vmem:[#allocation2 + $0xa8] sm:$0xff]  ;;  %v50_v54 = vld [vmem:[#allocation2 + $0xa0] sm:$0xff]  ;;  %v704_v61 = vsel %vm62_vm0, %v646_v56, 0.0  ;;  %v650_v62 = vmul.f32 %v1127_v44, %v1127_v44  ;;  %v652_v12 = vmul.f32 %v1074_v26, %v1074_v26 }
   0xf   :  { %907 = vmatpush.xpose.msk.msra.mxu1 %vm62_vm0, %v35_v15  ;;  %v1149_v53 = vld [vmem:[#allocation2 + $0xe8] sm:$0xff]  ;;  %v46_v57 = vld [vmem:[#allocation2 + $0x80] sm:$0xff]  ;;  %v658_v18 = vmul.f32 %v1125_v43, %v1125_v43  ;;  %vm617_vm5 = vcmask 1042434   ;;  %vm619_vm6 = vcmask 1043459   ;;  %vm621_vm7 = vcmask 1044484  }
  0x10   :  { %923 = vmatpush.xpose.msk.msra.mxu3 %vm62_vm0, %v1059_v16  ;;  %v1165_v59 = vld [vmem:[#allocation2 + $0xe0] sm:$0xff]  ;;  %vm623_vm8 = vcmask 1045509   ;;  %vm625_vm9 = vcmask 1046534   ;;  %vm627_vm10 = vcmask 1047559   ;;  %vm883_vm11 = vcmask 130048  }
  0x11   :  { %915 = vmatpush.xpose.msk.msra.mxu2 %vm62_vm0, %v39_v17  ;;  %v661_v24 = vmul.f32 %v1165_v59, %v1165_v59  ;;  %vm890_vm15 = vcmask 7168  }
  0x12   :  { %900 = vmatpush.xpose.msk.msra.mxu0 %vm62_vm0, %v30_v11  ;;  %672 = vadd.xlane.f32.xlu1 %v671_v25 }
  0x13   :  { %908 = vmatpush.xpose.msk.msra.mxu1 %vm62_vm0, %v34_v10  ;;  %684 = vadd.xlane.f32.xlu2 %v683_v27  ;;  %v749_v25 = vsel %vm62_vm0, %v661_v24, 0.0 }
  0x14   :  { %924 = vmatpush.xpose.msk.msra.mxu3 %vm62_vm0, %v42_v21  ;;  %681 = vadd.xlane.f32.xlu0 %v680_v28  ;;  %v662_v28 = vmul.f32 %v1149_v53, %v1149_v53 }
  0x15   :  { %916 = vmatpush.xpose.msk.msra.mxu2 %vm62_vm0, %v38_v22  ;;  %901 = vmatmul.msk.f32.vlgmr.msra.gmra.mxu0 %vm62_vm0, %v30_v11  ;;  %v657_v11 = vmul.f32 %v54_v52, %v54_v52 }
  0x16   :  { %929 = vmatpush.xpose.msk.msrb.mxu0 %vm62_vm0, %v1074_v26  ;;  %909 = vmatmul.msk.f32.vlgmr.msra.gmra.mxu1 %vm62_vm0, %v34_v10  ;;  %v655_v10 = vmul.f32 %v1120_v42, %v1120_v42  ;;  %v752_v29 = vsel %vm62_vm0, %v662_v28, 0.0 }
  0x17   :  { %925 = vmatmul.msk.f32.vlgmr.msra.gmra.mxu3 %vm62_vm0, %v42_v21  ;;  %937 = vmatpush.xpose.msk.msrb.mxu1 %vm62_vm0, %v1092_v32  ;;  %v737_v14 = vsel %vm62_vm0, %v657_v11, 0.0  ;;  %v740_v21 = vsel %vm62_vm0, %v658_v18, 0.0 }
  0x18   :  { %917 = vmatmul.msk.f32.vlgmr.msra.gmra.mxu2 %vm62_vm0, %v38_v22  ;;  %953 = vmatpush.xpose.msk.msrb.mxu3 %vm62_vm0, %v1088_v31  ;;  %v731_v13 = vsel %vm62_vm0, %v655_v10, 0.0  ;;  %v660_v22 = vmul.f32 %v1086_v30, %v1086_v30 }
  0x19   :  { %945 = vmatpush.xpose.msk.msrb.mxu2 %vm62_vm0, %v1086_v30 }
  0x1a   :  { %930 = vmatpush.xpose.msk.msrb.mxu0 %vm62_vm0, %v1094_v33  ;;  %693 = vadd.xlane.f32.xlu1 %v692_v36  ;;  %v746_v23 = vsel %vm62_vm0, %v660_v22, 0.0 }
  0x1b   :  { %675 = vadd.xlane.f32.xlu2 %v674_v38  ;;  %938 = vmatpush.xpose.msk.msrb.mxu1 %vm62_vm0, %v1120_v42 }
  0x1c   :  { %690 = vadd.xlane.f32.xlu0 %v689_v39  ;;  %954 = vmatpush.xpose.msk.msrb.mxu3 %vm62_vm0, %v1118_v41 }
  0x1d   :  { %946 = vmatpush.xpose.msk.msrb.mxu2 %vm62_vm0, %v1107_v37  ;;  %902 = vmatmul.msk.f32.gmra.mxu0 %vm62_vm0, %v1042_v6  ;;  %v651_v6 = vmul.f32 %v1094_v33, %v1094_v33 }
  0x1e   :  { %910 = vmatmul.msk.f32.gmra.mxu1 %vm62_vm0, %v35_v15  ;;  %931 = vmatpush.xpose.msk.msrb.mxu0 %vm62_vm0, %v1127_v44  ;;  %v722_v15 = vsel %vm62_vm0, %v652_v12, 0.0 }
  0x1f   :  { %926 = vmatmul.msk.f32.gmra.mxu3 %vm62_vm0, %v1059_v16  ;;  %939 = vmatpush.xpose.msk.msrb.mxu1 %vm62_vm0, %v51_v48  ;;  %v719_v9 = vsel %vm62_vm0, %v651_v6, 0.0  ;;  %v656_v16 = vmul.f32 %v1092_v32, %v1092_v32 }
  0x20   :  { %918 = vmatmul.msk.f32.gmra.mxu2 %vm62_vm0, %v39_v17  ;;  %955 = vmatpush.xpose.msk.msrb.mxu3 %vm62_vm0, %v1149_v53  ;;  %v659_v17 = vmul.f32 %v1107_v37, %v1107_v37 }
  0x21   :  { %947 = vmatpush.xpose.msk.msrb.mxu2 %vm62_vm0, %v1125_v43  ;;  %v734_v19 = vsel %vm62_vm0, %v656_v16, 0.0 }
  0x22   :  { %696 = vadd.xlane.f32.xlu1 %v695_v47  ;;  %932 = vmatpush.xpose.msk.msrb.mxu0 %vm62_vm0, %v46_v57  ;;  %v743_v20 = vsel %vm62_vm0, %v659_v17, 0.0 }
  0x23   :  { %702 = vadd.xlane.f32.xlu2 %v701_v49  ;;  %940 = vmatpush.xpose.msk.msrb.mxu1 %vm62_vm0, %v50_v54 }
  0x24   :  { %687 = vadd.xlane.f32.xlu0 %v686_v50  ;;  %956 = vmatpush.xpose.msk.msrb.mxu3 %vm62_vm0, %v1165_v59 }
  0x25   :  { %903 = vmatmul.msk.f32.gmra.mxu0 %vm62_vm0, %v1038_v4  ;;  %948 = vmatpush.xpose.msk.msrb.mxu2 %vm62_vm0, %v54_v52  ;;  %v649_v4 = vmul.f32 %v46_v57, %v46_v57 }
  0x26   :  { %911 = vmatmul.msk.f32.gmra.mxu1 %vm62_vm0, %v1040_v5  ;;  %v710_v5 = vsel %vm62_vm0, %v648_v63, 0.0 }
  0x27   :  { %927 = vmatmul.msk.f32.gmra.mxu3 %vm62_vm0, %v1044_v7 }
  0x28   :  { %919 = vmatmul.msk.f32.gmra.mxu2 %vm62_vm0, %v1046_v8 }
  0x2a   :  { %699 = vadd.xlane.f32.xlu1 %v698_v58 }
  0x2b   :  { %708 = vadd.xlane.f32.xlu2 %v707_v60 }
  0x2c   :  { %705 = vadd.xlane.f32.xlu0 %v704_v61 }
  0x2d   :  { %904 = vmatmul.msk.f32.gmra.mxu0 %vm62_vm0, %v1022_v0  ;;  %v716_v0 = vsel %vm62_vm0, %v650_v62, 0.0 }
  0x2e   :  { %912 = vmatmul.msk.f32.gmra.mxu1 %vm62_vm0, %v1024_v1  ;;  %v713_v1 = vsel %vm62_vm0, %v649_v4, 0.0 }
  0x2f   :  { %928 = vmatmul.msk.f32.gmra.mxu3 %vm62_vm0, %v1026_v2  ;;  %v654_v2 = vmul.f32 %v51_v48, %v51_v48 }
  0x30   :  { %920 = vmatmul.msk.f32.gmra.mxu2 %vm62_vm0, %v1032_v3  ;;  %v653_v3 = vmul.f32 %v50_v54, %v50_v54 }
  0x31   :  { %v728_v8 = vsel %vm62_vm0, %v654_v2, 0.0 }
  0x32   :  { %717 = vadd.xlane.f32.xlu1 %v716_v0  ;;  %v725_v7 = vsel %vm62_vm0, %v653_v3, 0.0 }
  0x33   :  { %711 = vadd.xlane.f32.xlu2 %v710_v5 }
  0x34   :  { %714 = vadd.xlane.f32.xlu0 %v713_v1 }
  0x35   :  { %933 = vmatmul.msk.f32.vlgmr.msrb.gmra.mxu0 %vm62_vm0, %v46_v57 }
  0x36   :  { %941 = vmatmul.msk.f32.vlgmr.msrb.gmra.mxu1 %vm62_vm0, %v50_v54 }
  0x37   :  { %957 = vmatmul.msk.f32.vlgmr.msrb.gmra.mxu3 %vm62_vm0, %v1165_v59 }
  0x38   :  { %949 = vmatmul.msk.f32.vlgmr.msrb.gmra.mxu2 %vm62_vm0, %v54_v52 }
  0x3a   :  { %726 = vadd.xlane.f32.xlu1 %v725_v7 }
  0x3b   :  { %729 = vadd.xlane.f32.xlu2 %v728_v8 }
  0x3c   :  { %720 = vadd.xlane.f32.xlu0 %v719_v9 }
  0x3d   :  { %934 = vmatmul.msk.f32.gmra.mxu0 %vm62_vm0, %v1127_v44 }
  0x3e   :  { %942 = vmatmul.msk.f32.gmra.mxu1 %vm62_vm0, %v51_v48 }
  0x3f   :  { %958 = vmatmul.msk.f32.gmra.mxu3 %vm62_vm0, %v1149_v53 }
  0x40   :  { %950 = vmatmul.msk.f32.gmra.mxu2 %vm62_vm0, %v1125_v43 }
  0x42   :  { %732 = vadd.xlane.f32.xlu1 %v731_v13 }
  0x43   :  { %738 = vadd.xlane.f32.xlu2 %v737_v14 }
  0x44   :  { %723 = vadd.xlane.f32.xlu0 %v722_v15 }
  0x45   :  { %935 = vmatmul.msk.f32.gmra.mxu0 %vm62_vm0, %v1094_v33 }
  0x46   :  { %943 = vmatmul.msk.f32.gmra.mxu1 %vm62_vm0, %v1120_v42 }
  0x47   :  { %959 = vmatmul.msk.f32.gmra.mxu3 %vm62_vm0, %v1118_v41 }
  0x48   :  { %951 = vmatmul.msk.f32.gmra.mxu2 %vm62_vm0, %v1107_v37 }
  0x4a   :  { %735 = vadd.xlane.f32.xlu1 %v734_v19 }
  0x4b   :  { %744 = vadd.xlane.f32.xlu2 %v743_v20 }
  0x4c   :  { %741 = vadd.xlane.f32.xlu0 %v740_v21 }
  0x4d   :  { %936 = vmatmul.msk.f32.gmra.mxu0 %vm62_vm0, %v1074_v26  ;;  %v551_v26 = vlaneseq }
  0x4e   :  { %944 = vmatmul.msk.f32.gmra.mxu1 %vm62_vm0, %v1092_v32 }
  0x4f   :  { %960 = vmatmul.msk.f32.gmra.mxu3 %vm62_vm0, %v1088_v31  ;;  %v1241_v27 = vand.u32 127, %v551_v26 }
  0x50   :  { %952 = vmatmul.msk.f32.gmra.mxu2 %vm62_vm0, %v1086_v30 }
  0x51   :  { %v1247_v32 = vadd.s32 4294967288, %v1241_v27  ;;  %v1253_v38 = vadd.s32 4294967280, %v1241_v27  ;;  %v1263_v51 = vadd.s32 4294967272, %v1241_v27 }
  0x52   :  { %753 = vadd.xlane.f32.xlu1 %v752_v29 }
  0x53   :  { %747 = vadd.xlane.f32.xlu2 %v746_v23 }
  0x54   :  { %750 = vadd.xlane.f32.xlu0 %v749_v25 }
  0x7d   :  { %v670_v30 = vpop.xlane.xlu1 %669 }
  0x7e   :  { %v679_v33 = vpop.xlane.xlu2 %678  ;;  %v794_v35 = vperm.slane %v670_v30, %v1247_v32 }
  0x7f   :  { %v667_v34 = vpop.xlane.xlu0 %666  ;;  %v800_v42 = vperm.slane %v679_v33, %v1241_v27 }
  0x80   :  { %v793_v36 = vperm.slane %v667_v34, %v1241_v27 }
  0x82   :  { %v795_v37 = vsel %vm556_vm1, %v794_v35, %v793_v36 }
  0x85   :  { %v673_v39 = vpop.xlane.xlu1 %672 }
  0x86   :  { %v796_v40 = vperm.slane %v673_v39, %v1253_v38  ;;  %v685_v43 = vpop.xlane.xlu2 %684 }
  0x87   :  { %v682_v44 = vpop.xlane.xlu0 %681  ;;  %v803_v46 = vperm.slane %v685_v43, %v1253_v38 }
  0x88   :  { %v797_v45 = vsel %vm560_vm2, %v796_v40, %v795_v37  ;;  %v801_v47 = vperm.slane %v682_v44, %v1247_v32 }
  0x8a   :  { %v802_v48 = vsel %vm556_vm1, %v801_v47, %v800_v42 }
  0x8b   :  { %v804_v49 = vsel %vm560_vm2, %v803_v46, %v802_v48 }
  0x8d   :  { %v694_v50 = vpop.xlane.xlu1 %693 }
  0x8e   :  { %v808_v54 = vperm.slane %v694_v50, %v1247_v32  ;;  %v676_v57 = vpop.xlane.xlu2 %675 }
  0x8f   :  { %v691_v58 = vpop.xlane.xlu0 %690  ;;  %v798_v59 = vperm.slane %v676_v57, %v1263_v51 }
  0x90   :  { %v807_v60 = vperm.slane %v691_v58, %v1241_v27 }
  0x91   :  { %v799_v63 = vsel %vm564_vm3, %v798_v59, %v797_v45 }
  0x92   :  { %v92_v52 = vpop.f32.mrf.mxu0  ;;  %v809_v4 = vsel %vm556_vm1, %v808_v54, %v807_v60 }
  0x93   :  { %v133_v53 = vpop.f32.mrf.mxu1  ;;  %v391_v55 = vmul.f32 %v92_v52, %v92_v52 }
  0x94   :  { %v395_v56 = vmul.f32 %v133_v53, %v133_v53 }
  0x95   :  { %v423_v62 = vsel %vm62_vm0, %v391_v55, 0.0  ;;  %v697_v0 = vpop.xlane.xlu1 %696 }
  0x96   :  { %v435_v61 = vsel %vm62_vm0, %v395_v56, 0.0  ;;  %424 = vadd.xlane.f32.xlu0 %v423_v62  ;;  %v810_v5 = vperm.slane %v697_v0, %v1253_v38  ;;  %v703_v10 = vpop.xlane.xlu2 %702 }
  0x97   :  { %436 = vadd.xlane.f32.xlu2 %v435_v61  ;;  %v688_v11 = vpop.xlane.xlu0 %687  ;;  %v814_v23 = vperm.slane %v703_v10, %v1241_v27 }
  0x98   :  { %v811_v9 = vsel %vm560_vm2, %v810_v5, %v809_v4  ;;  %v805_v13 = vperm.slane %v688_v11, %v1263_v51 }
  0x9a   :  { %v215_v1 = vpop.f32.mrf.mxu3  ;;  %v95_v7 = vpop.f32.mrf.mxu0  ;;  %v806_v15 = vsel %vm564_vm3, %v805_v13, %v804_v49 }
  0x9b   :  { %v174_v3 = vpop.f32.mrf.mxu2  ;;  %v403_v2 = vmul.f32 %v215_v1, %v215_v1  ;;  %v136_v8 = vpop.f32.mrf.mxu1  ;;  %v849_v17 = vsel %vm615_vm4, %v806_v15, %v799_v63  ;;  %v392_v20 = vmul.f32 %v95_v7, %v95_v7 }
  0x9c   :  { %v399_v6 = vmul.f32 %v174_v3, %v174_v3  ;;  %v396_v16 = vmul.f32 %v136_v8, %v136_v8 }
  0x9d   :  { %v459_v14 = vsel %vm62_vm0, %v403_v2, 0.0  ;;  %v700_v18 = vpop.xlane.xlu1 %699  ;;  %v426_v39 = vsel %vm62_vm0, %v392_v20, 0.0 }
  0x9e   :  { %v447_v12 = vsel %vm62_vm0, %v399_v6, 0.0  ;;  %460 = vadd.xlane.f32.xlu0 %v459_v14  ;;  %v812_v19 = vperm.slane %v700_v18, %v1263_v51  ;;  %v709_v29 = vpop.xlane.xlu2 %708  ;;  %v438_v30 = vsel %vm62_vm0, %v396_v16, 0.0 }
  0x9f   :  { %448 = vadd.xlane.f32.xlu2 %v447_v12  ;;  %v706_v33 = vpop.xlane.xlu0 %705  ;;  %v817_v36 = vperm.slane %v709_v29, %v1253_v38 }
  0xa0   :  { %v813_v26 = vsel %vm564_vm3, %v812_v19, %v811_v9  ;;  %v815_v37 = vperm.slane %v706_v33, %v1247_v32 }
  0xa1   :  { %v850_v34 = vsel %vm617_vm5, %v813_v26, %v849_v17 }
  0xa2   :  { %v218_v21 = vpop.f32.mrf.mxu3  ;;  %v98_v25 = vpop.f32.mrf.mxu0  ;;  %v816_v42 = vsel %vm556_vm1, %v815_v37, %v814_v23 }
  0xa3   :  { %v177_v22 = vpop.f32.mrf.mxu2  ;;  %v404_v24 = vmul.f32 %v218_v21, %v218_v21  ;;  %v139_v28 = vpop.f32.mrf.mxu1  ;;  %v393_v40 = vmul.f32 %v98_v25, %v98_v25  ;;  %v818_v43 = vsel %vm560_vm2, %v817_v36, %v816_v42 }
  0xa4   :  { %v400_v45 = vmul.f32 %v177_v22, %v177_v22  ;;  %v397_v4 = vmul.f32 %v139_v28, %v139_v28 }
  0xa5   :  { %v462_v35 = vsel %vm62_vm0, %v404_v24, 0.0  ;;  %v718_v44 = vpop.xlane.xlu1 %717  ;;  %v429_v49 = vsel %vm62_vm0, %v393_v40, 0.0 }
  0xa6   :  { %463 = vadd.xlane.f32.xlu1 %v462_v35  ;;  %427 = vadd.xlane.f32.xlu0 %v426_v39  ;;  %v822_v50 = vperm.slane %v718_v44, %v1247_v32  ;;  %v712_v54 = vpop.xlane.xlu2 %711  ;;  %v450_v59 = vsel %vm62_vm0, %v400_v45, 0.0  ;;  %v441_v9 = vsel %vm62_vm0, %v397_v4, 0.0 }
  0xa7   :  { %439 = vadd.xlane.f32.xlu2 %v438_v30  ;;  %v715_v55 = vpop.xlane.xlu0 %714  ;;  %v819_v56 = vperm.slane %v712_v54, %v1263_v51 }
  0xa8   :  { %v821_v58 = vperm.slane %v715_v55, %v1241_v27 }
  0xa9   :  { %v820_v61 = vsel %vm564_vm3, %v819_v56, %v818_v43 }
  0xaa   :  { %v221_v47 = vpop.f32.mrf.mxu3  ;;  %v101_v52 = vpop.f32.mrf.mxu0  ;;  %v823_v62 = vsel %vm556_vm1, %v822_v50, %v821_v58  ;;  %v851_v63 = vsel %vm619_vm6, %v820_v61, %v850_v34 }
  0xab   :  { %v180_v46 = vpop.f32.mrf.mxu2  ;;  %v405_v48 = vmul.f32 %v221_v47, %v221_v47  ;;  %v142_v53 = vpop.f32.mrf.mxu1  ;;  %v394_v15 = vmul.f32 %v101_v52, %v101_v52 }
  0xac   :  { %v401_v60 = vmul.f32 %v180_v46, %v180_v46  ;;  %v398_v35 = vmul.f32 %v142_v53, %v142_v53 }
  0xad   :  { %v465_v57 = vsel %vm62_vm0, %v405_v48, 0.0  ;;  %v727_v0 = vpop.xlane.xlu1 %726  ;;  %v432_v22 = vsel %vm62_vm0, %v394_v15, 0.0 }
  0xae   :  { %430 = vadd.xlane.f32.xlu1 %v429_v49  ;;  %451 = vadd.xlane.f32.xlu0 %v450_v59  ;;  %v453_v3 = vsel %vm62_vm0, %v401_v60, 0.0  ;;  %v828_v6 = vperm.slane %v727_v0, %v1241_v27  ;;  %v730_v8 = vpop.xlane.xlu2 %729  ;;  %v444_v45 = vsel %vm62_vm0, %v398_v35, 0.0 }
  0xaf   :  { %466 = vadd.xlane.f32.xlu2 %v465_v57  ;;  %v721_v10 = vpop.xlane.xlu0 %720  ;;  %v829_v11 = vperm.slane %v730_v8, %v1247_v32 }
  0xb0   :  { %v824_v13 = vperm.slane %v721_v10, %v1253_v38 }
  0xb1   :  { %v830_v17 = vsel %vm556_vm1, %v829_v11, %v828_v6 }
  0xb2   :  { %v224_v2 = vpop.f32.mrf.mxu3  ;;  %v256_v7 = vpop.f32.mrf.mxu0  ;;  %v825_v16 = vsel %vm560_vm2, %v824_v13, %v823_v62 }
  0xb3   :  { %v183_v5 = vpop.f32.mrf.mxu2  ;;  %v297_v14 = vpop.f32.mrf.mxu1  ;;  %v406_v18 = vmul.f32 %v224_v2, %v224_v2  ;;  %v407_v58 = vmul.f32 %v256_v7, %v256_v7 }
  0xb4   :  { %v402_v1 = vmul.f32 %v183_v5, %v183_v5  ;;  %v411_v19 = vmul.f32 %v297_v14, %v297_v14 }
  0xb5   :  { %v733_v20 = vpop.xlane.xlu1 %732  ;;  %v468_v28 = vsel %vm62_vm0, %v406_v18, 0.0 }
  0xb6   :  { %v456_v12 = vsel %vm62_vm0, %v402_v1, 0.0  ;;  %454 = vadd.xlane.f32.xlu1 %v453_v3  ;;  %442 = vadd.xlane.f32.xlu0 %v441_v9  ;;  %v831_v21 = vperm.slane %v733_v20, %v1253_v38  ;;  %v739_v26 = vpop.xlane.xlu2 %738  ;;  %v483_v30 = vsel %vm62_vm0, %v411_v19, 0.0 }
  0xb7   :  { %457 = vadd.xlane.f32.xlu2 %v456_v12  ;;  %v724_v29 = vpop.xlane.xlu0 %723  ;;  %v835_v44 = vperm.slane %v739_v26, %v1241_v27 }
  0xb8   :  { %v832_v24 = vsel %vm560_vm2, %v831_v21, %v830_v17  ;;  %v826_v33 = vperm.slane %v724_v29, %v1263_v51 }
  0xba   :  { %v379_v25 = vpop.f32.mrf.mxu3  ;;  %v259_v34 = vpop.f32.mrf.mxu0  ;;  %v827_v36 = vsel %vm564_vm3, %v826_v33, %v825_v16  ;;  %v663_v33 = vmul.f32 %v1118_v41, %v1118_v41  ;;  %v664_v41 = vmul.f32 %v1088_v31, %v1088_v31 }
  0xbb   :  { %v338_v23 = vpop.f32.mrf.mxu2  ;;  %v852_v39 = vsel %vm621_vm7, %v827_v36, %v851_v63  ;;  %v408_v40 = vmul.f32 %v259_v34, %v259_v34  ;;  %v300_v46 = vpop.f32.mrf.mxu1  ;;  %v471_v63 = vsel %vm62_vm0, %v407_v58, 0.0  ;;  %v419_v7 = vmul.f32 %v379_v25, %v379_v25 }
  0xbc   :  { %v415_v37 = vmul.f32 %v338_v23, %v338_v23  ;;  %v412_v60 = vmul.f32 %v300_v46, %v300_v46  ;;  %v755_v35 = vsel %vm62_vm0, %v663_v33, 0.0  ;;  %v758_v46 = vsel %vm62_vm0, %v664_v41, 0.0 }
  0xbd   :  { %v736_v42 = vpop.xlane.xlu1 %735  ;;  %v474_v53 = vsel %vm62_vm0, %v408_v40, 0.0  ;;  %v507_v12 = vsel %vm62_vm0, %v419_v7, 0.0 }
  0xbe   :  { %433 = vadd.xlane.f32.xlu1 %v432_v22  ;;  %469 = vadd.xlane.f32.xlu0 %v468_v28  ;;  %v833_v43 = vperm.slane %v736_v42, %v1263_v51  ;;  %v745_v49 = vpop.xlane.xlu2 %744  ;;  %v495_v50 = vsel %vm62_vm0, %v415_v37, 0.0  ;;  %v486_v5 = vsel %vm62_vm0, %v412_v60, 0.0 }
  0xbf   :  { %484 = vadd.xlane.f32.xlu2 %v483_v30  ;;  %v742_v52 = vpop.xlane.xlu0 %741  ;;  %v838_v55 = vperm.slane %v745_v49, %v1253_v38 }
  0xc0   :  { %v834_v47 = vsel %vm564_vm3, %v833_v43, %v832_v24  ;;  %v836_v56 = vperm.slane %v742_v52, %v1247_v32 }
  0xc1   :  { %v853_v54 = vsel %vm623_vm8, %v834_v47, %v852_v39 }
  0xc2   :  { %v382_v57 = vpop.f32.mrf.mxu3  ;;  %v837_v59 = vsel %vm556_vm1, %v836_v56, %v835_v44  ;;  %v262_v2 = vpop.f32.mrf.mxu0 }
  0xc3   :  { %v341_v48 = vpop.f32.mrf.mxu2  ;;  %v839_v61 = vsel %vm560_vm2, %v838_v55, %v837_v59  ;;  %v420_v62 = vmul.f32 %v382_v57, %v382_v57  ;;  %v303_v4 = vpop.f32.mrf.mxu1  ;;  %v409_v9 = vmul.f32 %v262_v2, %v262_v2 }
  0xc4   :  { %v416_v17 = vmul.f32 %v341_v48, %v341_v48  ;;  %v413_v24 = vmul.f32 %v303_v4, %v303_v4 }
  0xc5   :  { %v510_v1 = vsel %vm62_vm0, %v420_v62, 0.0  ;;  %v477_v13 = vsel %vm62_vm0, %v409_v9, 0.0  ;;  %v754_v42 = vpop.xlane.xlu1 %753 }
  0xc6   :  { %445 = vadd.xlane.f32.xlu1 %v444_v45  ;;  %496 = vadd.xlane.f32.xlu0 %v495_v50  ;;  %v748_v0 = vpop.xlane.xlu2 %747  ;;  %v498_v20 = vsel %vm62_vm0, %v416_v17, 0.0  ;;  %v489_v26 = vsel %vm62_vm0, %v413_v24, 0.0  ;;  %v843_v43 = vperm.slane %v754_v42, %v1247_v32 }
  0xc7   :  { %475 = vadd.xlane.f32.xlu2 %v474_v53  ;;  %v840_v3 = vperm.slane %v748_v0, %v1263_v51  ;;  %v751_v37 = vpop.xlane.xlu0 %750 }
  0xc8   :  { %v842_v40 = vperm.slane %v751_v37, %v1241_v27 }
  0xc9   :  { %v841_v8 = vsel %vm564_vm3, %v840_v3, %v839_v61 }
  0xca   :  { %v1332_v11 = vsel %vm625_vm9, %v841_v8, %v853_v54  ;;  %v385_v15 = vpop.f32.mrf.mxu3  ;;  %v265_v29 = vpop.f32.mrf.mxu0  ;;  %v1350_v45 = vsel %vm556_vm1, %v843_v43, %v842_v40 }
  0xcb   :  { %v344_v6 = vpop.f32.mrf.mxu2  ;;  %v306_v16 = vpop.f32.mrf.mxu1  ;;  %v421_v18 = vmul.f32 %v385_v15, %v385_v15  ;;  %v410_v30 = vmul.f32 %v265_v29, %v265_v29 }
  0xcc   :  { %v417_v10 = vmul.f32 %v344_v6, %v344_v6  ;;  %v414_v19 = vmul.f32 %v306_v16, %v306_v16 }
  0xcd   :  { %v513_v21 = vsel %vm62_vm0, %v421_v18, 0.0  ;;  %v480_v34 = vsel %vm62_vm0, %v410_v30, 0.0 }
  0xce   :  { %472 = vadd.xlane.f32.xlu1 %v471_v63  ;;  %487 = vadd.xlane.f32.xlu0 %v486_v5  ;;  %v501_v14 = vsel %vm62_vm0, %v417_v10, 0.0  ;;  %v492_v22 = vsel %vm62_vm0, %v414_v19, 0.0 }
  0xcf   :  { %511 = vadd.xlane.f32.xlu2 %v510_v1 }
  0xd2   :  { %v388_v36 = vpop.f32.mrf.mxu3 }
  0xd3   :  { %v347_v23 = vpop.f32.mrf.mxu2  ;;  %v422_v39 = vmul.f32 %v388_v36, %v388_v36 }
  0xd4   :  { %v418_v25 = vmul.f32 %v347_v23, %v347_v23 }
  0xd5   :  { %v516_v44 = vsel %vm62_vm0, %v422_v39, 0.0 }
  0xd6   :  { %508 = vadd.xlane.f32.xlu1 %v507_v12  ;;  %478 = vadd.xlane.f32.xlu0 %v477_v13  ;;  %v504_v28 = vsel %vm62_vm0, %v418_v25, 0.0 }
  0xd7   :  { %502 = vadd.xlane.f32.xlu2 %v501_v14 }
  0xde   :  { %499 = vadd.xlane.f32.xlu1 %v498_v20  ;;  %514 = vadd.xlane.f32.xlu0 %v513_v21 }
  0xdf   :  { %493 = vadd.xlane.f32.xlu2 %v492_v22 }
  0xe6   :  { %490 = vadd.xlane.f32.xlu1 %v489_v26  ;;  %505 = vadd.xlane.f32.xlu0 %v504_v28 }
  0xee   :  { %481 = vadd.xlane.f32.xlu1 %v480_v34  ;;  %756 = vadd.xlane.f32.xlu0 %v755_v35 }
  0xf6   :  { %517 = vadd.xlane.f32.xlu1 %v516_v44 }
  0xfe   :  { %759 = vadd.xlane.f32.xlu1 %v758_v46 }
 0x109   :  { %v425_v48 = vpop.xlane.xlu0 %424 }
 0x10a   :  { %v437_v47 = vpop.xlane.xlu2 %436  ;;  %v553_v31 = vperm.slane %v425_v48, %v1241_v27 }
 0x10b   :  { %v566_v7 = vperm.slane %v437_v47, %v1241_v27  ;;  %v998_v47 = vmov 0  }
 0x10c   :  { %965 = vset.pattern.permute.xlu2 %v998_v47  ;;  %966 = vset.pattern.permute.xlu0 %v998_v47 }
 0x111   :  { %v461_v49 = vpop.xlane.xlu0 %460 }
 0x112   :  { %v449_v50 = vpop.xlane.xlu2 %448  ;;  %v580_v53 = vperm.slane %v461_v49, %v1241_v27 }
 0x113   :  { %v573_v10 = vperm.slane %v449_v50, %v1241_v27 }
 0x119   :  { %v464_v52 = vpop.xlane.xlu1 %463  ;;  %v428_v55 = vpop.xlane.xlu0 %427 }
 0x11a   :  { %v581_v54 = vperm.slane %v464_v52, %v1247_v32  ;;  %v440_v57 = vpop.xlane.xlu2 %439  ;;  %v555_v58 = vperm.slane %v428_v55, %v1247_v32 }
 0x11b   :  { %v567_v8 = vperm.slane %v440_v57, %v1247_v32 }
 0x11c   :  { %v582_v56 = vsel %vm556_vm1, %v581_v54, %v580_v53  ;;  %v557_v62 = vsel %vm556_vm1, %v555_v58, %v553_v31 }
 0x11d   :  { %v568_v19 = vsel %vm556_vm1, %v567_v8, %v566_v7 }
 0x121   :  { %v431_v59 = vpop.xlane.xlu1 %430  ;;  %v452_v61 = vpop.xlane.xlu0 %451 }
 0x122   :  { %v559_v60 = vperm.slane %v431_v59, %v1253_v38  ;;  %v467_v4 = vpop.xlane.xlu2 %466  ;;  %v574_v6 = vperm.slane %v452_v61, %v1247_v32 }
 0x123   :  { %v583_v14 = vperm.slane %v467_v4, %v1253_v38 }
 0x124   :  { %v561_v63 = vsel %vm560_vm2, %v559_v60, %v557_v62  ;;  %v575_v15 = vsel %vm556_vm1, %v574_v6, %v573_v10 }
 0x125   :  { %v584_v28 = vsel %vm560_vm2, %v583_v14, %v582_v56 }
 0x129   :  { %v455_v0 = vpop.xlane.xlu1 %454  ;;  %v443_v5 = vpop.xlane.xlu0 %442 }
 0x12a   :  { %v458_v1 = vpop.xlane.xlu2 %457  ;;  %v576_v9 = vperm.slane %v455_v0, %v1253_v38  ;;  %v569_v12 = vperm.slane %v443_v5, %v1253_v38 }
 0x12b   :  { %v578_v16 = vperm.slane %v458_v1, %v1263_v51 }
 0x12c   :  { %v577_v20 = vsel %vm560_vm2, %v576_v9, %v575_v15  ;;  %v570_v24 = vsel %vm560_vm2, %v569_v12, %v568_v19 }
 0x12d   :  { %v579_v29 = vsel %vm564_vm3, %v578_v16, %v577_v20 }
 0x131   :  { %v434_v3 = vpop.xlane.xlu1 %433  ;;  %v470_v2 = vpop.xlane.xlu0 %469 }
 0x132   :  { %v563_v13 = vperm.slane %v434_v3, %v1263_v51  ;;  %v485_v17 = vpop.xlane.xlu2 %484  ;;  %v585_v21 = vperm.slane %v470_v2, %v1263_v51 }
 0x133   :  { %v594_v53 = vperm.slane %v485_v17, %v1241_v27 }
 0x134   :  { %v565_v25 = vsel %vm564_vm3, %v563_v13, %v561_v63  ;;  %v586_v33 = vsel %vm564_vm3, %v585_v21, %v584_v28 }
 0x139   :  { %v446_v18 = vpop.xlane.xlu1 %445  ;;  %v497_v23 = vpop.xlane.xlu0 %496 }
 0x13a   :  { %v571_v22 = vperm.slane %v446_v18, %v1263_v51  ;;  %v476_v37 = vpop.xlane.xlu2 %475  ;;  %v601_v0 = vperm.slane %v497_v23, %v1241_v27 }
 0x13b   :  { %v588_v50 = vperm.slane %v476_v37, %v1247_v32 }
 0x13c   :  { %v572_v26 = vsel %vm564_vm3, %v571_v22, %v570_v24 }
 0x13d   :  { %v616_v30 = vsel %vm615_vm4, %v572_v26, %v565_v25 }
 0x13e   :  { %v618_v34 = vsel %vm617_vm5, %v579_v29, %v616_v30 }
 0x13f   :  { %v620_v35 = vsel %vm619_vm6, %v586_v33, %v618_v34  ;;  %v877_v33 = vld [vmem:[%s1436_s1] sm:$0xff] }
 0x141   :  { %v473_v36 = vpop.xlane.xlu1 %472  ;;  %v488_v39 = vpop.xlane.xlu0 %487 }
 0x142   :  { %v512_v42 = vpop.xlane.xlu2 %511  ;;  %v587_v49 = vperm.slane %v473_v36, %v1241_v27  ;;  %v595_v54 = vperm.slane %v488_v39, %v1247_v32 }
 0x143   :  { %v609_v3 = vperm.slane %v512_v42, %v1247_v32 }
 0x144   :  { %v589_v58 = vsel %vm556_vm1, %v588_v50, %v587_v49  ;;  %v596_v62 = vsel %vm556_vm1, %v595_v54, %v594_v53 }
 0x149   :  { %v509_v40 = vpop.xlane.xlu1 %508  ;;  %v479_v43 = vpop.xlane.xlu0 %478 }
 0x14a   :  { %v503_v41 = vpop.xlane.xlu2 %502  ;;  %v590_v52 = vperm.slane %v479_v43, %v1253_v38  ;;  %v608_v1 = vperm.slane %v509_v40, %v1241_v27 }
 0x14b   :  { %v604_v2 = vperm.slane %v503_v41, %v1253_v38 }
 0x14c   :  { %v591_v60 = vsel %vm560_vm2, %v590_v52, %v589_v58  ;;  %v610_v14 = vsel %vm556_vm1, %v609_v3, %v608_v1 }
 0x151   :  { %v500_v44 = vpop.xlane.xlu1 %499  ;;  %v515_v46 = vpop.xlane.xlu0 %514 }
 0x152   :  { %v494_v56 = vpop.xlane.xlu2 %493  ;;  %v602_v61 = vperm.slane %v500_v44, %v1247_v32  ;;  %v611_v8 = vperm.slane %v515_v46, %v1253_v38 }
 0x153   :  { %v599_v63 = vperm.slane %v494_v56, %v1263_v51 }
 0x154   :  { %v603_v7 = vsel %vm556_vm1, %v602_v61, %v601_v0  ;;  %v612_v16 = vsel %vm560_vm2, %v611_v8, %v610_v14 }
 0x155   :  { %v605_v15 = vsel %vm560_vm2, %v604_v2, %v603_v7 }
 0x159   :  { %v491_v48 = vpop.xlane.xlu1 %490  ;;  %v506_v31 = vpop.xlane.xlu0 %505 }
 0x15a   :  { %v597_v55 = vperm.slane %v491_v48, %v1253_v38  ;;  %v606_v9 = vperm.slane %v506_v31, %v1263_v51 }
 0x15c   :  { %v598_v5 = vsel %vm560_vm2, %v597_v55, %v596_v62  ;;  %v607_v17 = vsel %vm564_vm3, %v606_v9, %v605_v15 }
 0x15d   :  { %v600_v10 = vsel %vm564_vm3, %v599_v63, %v598_v5 }
 0x161   :  { %v482_v57 = vpop.xlane.xlu1 %481  ;;  %v757_v18 = vpop.xlane.xlu0 %756 }
 0x162   :  { %v592_v59 = vperm.slane %v482_v57, %v1263_v51  ;;  %v845_v23 = vperm.slane %v757_v18, %v1253_v38 }
 0x164   :  { %v593_v4 = vsel %vm564_vm3, %v592_v59, %v591_v60  ;;  %v846_v26 = vsel %vm560_vm2, %v845_v23, %v1350_v45 }
 0x165   :  { %v622_v6 = vsel %vm621_vm7, %v593_v4, %v620_v35 }
 0x166   :  { %v624_v13 = vsel %vm623_vm8, %v600_v10, %v622_v6 }
 0x167   :  { %v626_v20 = vsel %vm625_vm9, %v607_v17, %v624_v13 }
 0x169   :  { %v518_v12 = vpop.xlane.xlu1 %517 }
 0x16a   :  { %v613_v32 = vperm.slane %v518_v12, %v1263_v51 }
 0x16c   :  { %v614_v19 = vsel %vm564_vm3, %v613_v32, %v612_v16 }
 0x16d   :  { %v628_v21 = vsel %vm627_vm10, %v614_v19, %v626_v20 }
 0x16e   :  { %v630_v22 = vsel %vm62_vm0, %v628_v21, 0.0 }
 0x16f   :  { %631 = vadd.xlane.f32.xlu2 %v630_v22 }
 0x171   :  { %v760_v24 = vpop.xlane.xlu1 %759 }
 0x172   :  { %v847_v25 = vperm.slane %v760_v24, %v1263_v51  ;;  %v876_v51 = vld [vmem:[%s1435_s0] sm:$0xff] }
 0x174   :  { %v848_v28 = vsel %vm564_vm3, %v847_v25, %v846_v26 }
 0x175   :  { %v855_v29 = vsel %vm627_vm10, %v848_v28, %v1332_v11 }
 0x176   :  { %v857_v30 = vsel %vm62_vm0, %v855_v29, 0.0 }
 0x177   :  { %858 = vadd.xlane.f32.xlu0 %v857_v30 }
 0x187   :  { %879 = vperm.xlu2 %965, %v877_v33  }
 0x1e2   :  { %v632_v38 = vpop.xlane.xlu2 %631 }
 0x1ea   :  { %v880_v34 = vpop.permute.xlu2 %879  ;;  %v859_v11 = vpop.xlane.xlu0 %858 }
 0x1eb   :  { %vm881_vm12 = vcmp.eq.s32.totalorder %v1241_v27, %v880_v34  ;;  %v860_v36 = vmul.f32 2.0, %v859_v11 }
 0x1ec   :  { %v882_v45 = vsel %vm881_vm12, %v876_v51, 0.0 }
 0x1ed   :  { %v884_v35 = vsel %vm883_vm11, %v882_v45, 0.0  ;;  %v861_v37 = vsub.f32 %v632_v38, %v860_v36 }
 0x1ee   :  { %885 = vadd.xlane.f32.xlu1 %v884_v35 }
 0x1ef   :  { %v862_v39 = vadd.f32 32.0, %v861_v37 }
 0x1f1   :  { %v863_v40 = vmax.f32 %v862_v39, 0.0 }
 0x1f3   :  { %967 = vrsqrt.f32 %v863_v40  ;;  %vm871_vm13 = vcmp.eq.f32.partialorder %v863_v40, inf  ;;  %v874_v50 = vand.u32 2147483648, %v863_v40  ;;  %vm873_vm14 = vcmp.eq.f32.partialorder %v863_v40, 0.0 }
 0x1f9   :  { %v968_v42 = vpop.eup %967 }
 0x1fa   :  { %v865_v43 = vmul.f32 %v968_v42, %v863_v40 }
 0x1fc   :  { %v866_v44 = vmul.f32 %v968_v42, %v865_v43 }
 0x1fe   :  { %v867_v41 = vmul.f32 0.5, %v866_v44 }
 0x200   :  { %v868_v46 = vsub.f32 1.5, %v867_v41 }
 0x202   :  { %v869_v47 = vmul.f32 %v968_v42, %v868_v46 }
 0x204   :  { %v870_v48 = vmul.f32 %v869_v47, %v863_v40 }
 0x206   :  { %v872_v49 = vsel %vm871_vm13, %v863_v40, %v870_v48 }
 0x207   :  { %v875_v27 = vsel %vm873_vm14, %v874_v50, %v872_v49 }
 0x208   :  { %v888_v53 = vmul.f32 0.001, %v875_v27 }
 0x261   :  { %v886_v52 = vpop.xlane.xlu1 %885 }
 0x262   :  { %v887_v54 = vsub.f32 0.0, %v886_v52 }
 0x264   :  { %v889_v55 = vadd.f32 %v888_v53, %v887_v54 }
 0x266   :  { %891 = vst.msk [vmem:[%s1438_s3] sm:$0xff] %vm890_vm15, %v889_v55 }
 0x267   :  { %896 = vsyncpa [#allocation3], 1 }

</bundles_post_ra>
